<compile_context>
chip_gen: v7x
topology: tpu7x:2x2x1
jax: 0.10.0
libtpu: 0.0.40
codegen_flags: <defaults>
</compile_context>

<pallas_src>
import functools

import jax
import jax.numpy as jnp
from jax.experimental import pallas as pl
from jax.experimental.pallas import tpu as pltpu

LANE = 128


def _celoss_kernel(pred_ref, tgt_ref, w_ref, out_ref, acc_ref, *,
                   num_classes, hw, rows, tiles_per_part, need_mask):
    """pred_ref/tgt_ref: (1, C, rows, 128) VMEM tiles; w_ref: (C,) SMEM;
    out_ref: (1, 1, 2) SMEM [num, den] partials per (batch, part); acc_ref: (2, rows, 128)."""
    p = pl.program_id(1)
    i = pl.program_id(2)

    @pl.when(i == 0)
    def _():
        acc_ref[...] = jnp.zeros_like(acc_ref)

    # ---- fused streaming pass over classes (argmax + pick + weight + exp-sum) ----
    t0 = tgt_ref[0, 0].astype(jnp.float32)                    # (rows, 128)
    s0 = jax.nn.sigmoid(pred_ref[0, 0].astype(jnp.float32))   # (rows, 128)
    best = t0                                                 # running class max of target
    picked = s0                                               # sigmoid(pred) at argmax class
    w_best = jnp.full(t0.shape, w_ref[0], jnp.float32)        # weight at argmax class
    sum_exp = jnp.exp(s0)                                     # logsumexp accumulator

    if num_classes <= 16:
        # small C: fully unrolled, planes loaded one at a time (no (C,rows,128) temporary)
        for c in range(1, num_classes):
            tc = tgt_ref[0, c].astype(jnp.float32)
            sc = jax.nn.sigmoid(pred_ref[0, c].astype(jnp.float32))
            gt = tc > best                                    # strict '>' = first-occurrence tie-break
            best = jnp.where(gt, tc, best)
            picked = jnp.where(gt, sc, picked)
            w_best = jnp.where(gt, w_ref[c], w_best)
            sum_exp = sum_exp + jnp.exp(sc)
    else:
        # large C: rolled loop keeps vreg live ranges and compile time bounded
        def body(c, carry):
            best, picked, w_best, sum_exp = carry
            tc = tgt_ref[0, c].astype(jnp.float32)
            sc = jax.nn.sigmoid(pred_ref[0, c].astype(jnp.float32))
            gt = tc > best
            return (jnp.where(gt, tc, best),
                    jnp.where(gt, sc, picked),
                    jnp.where(gt, w_ref[c], w_best),
                    sum_exp + jnp.exp(sc))
        best, picked, w_best, sum_exp = jax.lax.fori_loop(
            1, num_classes, body, (best, picked, w_best, sum_exp))

    lse = jnp.log(sum_exp)                                    # (rows, 128)
    num = w_best * (lse - picked)                             # weighted NLL per pixel
    den = w_best                                              # weight per pixel

    if need_mask:  # static: only emitted for padded / partial-tail tiles
        row_ids = jax.lax.broadcasted_iota(jnp.int32, num.shape, 0)
        lane_ids = jax.lax.broadcasted_iota(jnp.int32, num.shape, 1)
        gidx = ((p * tiles_per_part + i) * rows + row_ids) * LANE + lane_ids
        valid = gidx < hw
        num = jnp.where(valid, num, 0.0)
        den = jnp.where(valid, den, 0.0)

    acc_ref[0] += num
    acc_ref[1] += den

    @pl.when(i == pl.num_programs(2) - 1)
    def _():
        out_ref[0, 0, 0] = jnp.sum(acc_ref[0])
        out_ref[0, 0, 1] = jnp.sum(acc_ref[1])


def _pick_tiling(hw, num_classes, in_itemsize, max_rows=1024):
    """Choose sublane-rows per tile under a generation-aware VMEM budget."""
    rows_total = pl.cdiv(hw, LANE)
    try:
        vmem_cap = pltpu.get_tpu_info().vmem_capacity_bytes
    except Exception:
        vmem_cap = 64 * 2 ** 20          # conservative (v7x-sized) fallback
    budget = min(vmem_cap // 3, 56 * 2 ** 20)
    # bytes per sublane-row of tile: double-buffered pred+tgt inputs + single acc scratch
    per_row = 2 * in_itemsize * num_classes * LANE + 2 * LANE * 4
    cap = max(8, budget // per_row)
    if rows_total <= min(cap, max_rows):
        rows = rows_total                 # full extent -> always a legal block dim
    else:
        rows = max(8, (min(cap, max_rows) // 8) * 8)
    num_row_tiles = pl.cdiv(rows_total, rows)
    return rows, rows_total, num_row_tiles, vmem_cap


def celoss_forward(pred, target, w, *, label_smoothing=0.0, masked=False, max_rows=1024):
    """pred, target: (N, C, H, W); w: (C,). Returns scalar float32 loss."""
    N, C, H, W = pred.shape
    assert w.shape == (C,), "Loss weights should be equal to the output channels."
    assert 0.0 <= label_smoothing < 1.0  # argmax-invariance of the smoothing affine map
    # NOTE: `masked` mask is dead code in the reference forward (computed, never used).

    HW = H * W
    in_itemsize = pred.dtype.itemsize + target.dtype.itemsize
    rows, rows_total, num_row_tiles, vmem_cap = _pick_tiling(
        HW, C, in_itemsize, max_rows=max_rows)

    pred3 = pred.reshape(N, C, HW)
    tgt3 = target.reshape(N, C, HW)
    if HW % LANE != 0:
        # TODO(synk): handle the ragged tail with a manual-DMA partial tile instead of a
        # full jnp.pad copy (extra HBM traffic); the lane-aligned fast path avoids it.
        pad = rows_total * LANE - HW
        pred3 = jnp.pad(pred3, ((0, 0), (0, 0), (0, pad)))
        tgt3 = jnp.pad(tgt3, ((0, 0), (0, 0), (0, pad)))
    pred4 = pred3.reshape(N, C, rows_total, LANE)   # free reshape (contiguous)
    tgt4 = tgt3.reshape(N, C, rows_total, LANE)
    w_sm = jnp.asarray(w, jnp.float32)

    # Split the row tiles across a second parallel axis only when N==1 (v7x megacore);
    # split exactly (even tile count) so no fully out-of-range block is ever requested.
    P = 2 if (N == 1 and num_row_tiles >= 2 and num_row_tiles % 2 == 0) else 1
    tiles_per_part = num_row_tiles // P
    need_mask = (P * tiles_per_part * rows * LANE) != HW

    kernel = functools.partial(
        _celoss_kernel, num_classes=C, hw=HW, rows=rows,
        tiles_per_part=tiles_per_part, need_mask=need_mask)

    needed_vmem = 2 * in_itemsize * C * rows * LANE + 2 * rows * LANE * 4
    vmem_limit = int(min(int(vmem_cap * 0.9),
                         max(32 * 2 ** 20, needed_vmem + 4 * 2 ** 20)))

    partials = pl.pallas_call(
        kernel,
        out_shape=jax.ShapeDtypeStruct((N, P, 2), jnp.float32),
        grid_spec=pltpu.PrefetchScalarGridSpec(
            num_scalar_prefetch=0,
            grid=(N, P, tiles_per_part),
            in_specs=[
                pl.BlockSpec((1, C, rows, LANE),
                             lambda n, p, i: (n, 0, p * tiles_per_part + i, 0)),
                pl.BlockSpec((1, C, rows, LANE),
                             lambda n, p, i: (n, 0, p * tiles_per_part + i, 0)),
                pl.BlockSpec(memory_space=pltpu.SMEM),        # class weights (C scalars)
            ],
            out_specs=pl.BlockSpec((1, 1, 2), lambda n, p, i: (n, p, 0),
                                   memory_space=pltpu.SMEM),
            scratch_shapes=[pltpu.VMEM((2, rows, LANE), jnp.float32)],
        ),
        compiler_params=pltpu.CompilerParams(
            dimension_semantics=("parallel", "parallel", "arbitrary"),
            vmem_limit_bytes=vmem_limit),
        cost_estimate=pl.CostEstimate(
            flops=int(10 * N * C * HW),
            transcendentals=int((3 * C + 1) * N * HW),
            bytes_accessed=int(in_itemsize * N * C * HW)),
    )(pred4, tgt4, w_sm)

    return jnp.sum(partials[..., 0]) / jnp.sum(partials[..., 1])


def celoss_reference(pred, target, w, *, label_smoothing=0.0):
    """Pure-JAX reference mirroring the PyTorch module."""
    C = pred.shape[1]
    t = target * (1.0 - label_smoothing) + label_smoothing / C
    y = jnp.argmax(t, axis=1)                                   # (N, H, W)
    s = jax.nn.sigmoid(pred)                                    # (N, C, H, W)
    lse = jax.scipy.special.logsumexp(s, axis=1)                # (N, H, W)
    picked = jnp.take_along_axis(s, y[:, None], axis=1)[:, 0]   # (N, H, W)
    wy = w[y]
    return jnp.sum(wy * (lse - picked)) / jnp.sum(wy)


if __name__ == "__main__":
    # Module config (deterministic, in-script): outchannels=4, per-class weights,
    # label_smoothing=0.1, act=Sigmoid, masked=False.
    B, C, H, W = 2, 4, 16, 16
    label_smoothing = 0.1
    w = jnp.array([1.0, 2.0, 0.5, 1.5], dtype=jnp.float32)

    key = jax.random.PRNGKey(0)
    k_pred, k_tgt = jax.random.split(key)
    pred = jax.random.normal(k_pred, (B, C, H, W), dtype=jnp.float32)
    # soft "one-hot-ish" targets (e.g. softmax of random logits)
    target = jax.nn.softmax(
        jax.random.normal(k_tgt, (B, C, H, W), dtype=jnp.float32) * 3.0, axis=1)

    loss = celoss_forward(pred, target, w, label_smoothing=label_smoothing)
    loss = jax.block_until_ready(loss)

    ref = celoss_reference(pred, target, w, label_smoothing=label_smoothing)
    assert jnp.allclose(loss, ref, rtol=1e-4, atol=1e-5), (loss, ref)

    print("KERNEL_OK")
</pallas_src>

<mosaic_0001>
module attributes {stable_mosaic.version = 11 : i64} {
  func.func @_celoss_kernel(%arg0: i32, %arg1: i32, %arg2: i32, %arg3: memref<1x4x2x128xf32, #tpu.memory_space<vmem>>, %arg4: memref<1x4x2x128xf32, #tpu.memory_space<vmem>>, %arg5: memref<4xf32, #tpu.memory_space<smem>>, %arg6: memref<1x1x2xf32, #tpu.memory_space<smem>>, %arg7: memref<2x2x128xf32, #tpu.memory_space<vmem>>) attributes {dimension_semantics = [#tpu.dimension_semantics<parallel>, #tpu.dimension_semantics<parallel>, #tpu.dimension_semantics<arbitrary>], iteration_bounds = array<i64: 2, 1, 1>, scalar_prefetch = 0 : i64, scratch_operands = 1 : i64, tpu.core_type = #tpu.core_type<tc>, window_params = [{transform_indices = @transform_0, window_bounds = array<i64: 1, 4, 2, 128>}, {transform_indices = @transform_1, window_bounds = array<i64: 1, 4, 2, 128>}, {transform_indices = @transform_2, window_bounds = array<i64: 4>}, {transform_indices = @transform_3, window_bounds = array<i64: 1, 1, 2>}]} {
    %c0_i32 = arith.constant 0 : i32
    %0 = arith.cmpi eq, %arg2, %c0_i32 : i32
    %1 = arith.extui %0 : i1 to i32
    %c0_i32_0 = arith.constant 0 : i32
    %2 = arith.cmpi ne, %1, %c0_i32_0 : i32
    scf.if %2 {
      %cst_50 = arith.constant 0.000000e+00 : f32
      %83 = vector.broadcast %cst_50 : f32 to vector<2x2x128xf32>
      %c0_51 = arith.constant 0 : index
      %c0_52 = arith.constant 0 : index
      %c0_53 = arith.constant 0 : index
      %84 = vector.load %arg7[%c0_51, %c0_52, %c0_53] : memref<2x2x128xf32, #tpu.memory_space<vmem>>, vector<2x2x128xf32>
      tpu.vector_store %arg7[%c0_51, %c0_52, %c0_53], %83 {strides = array<i32>} : memref<2x2x128xf32, #tpu.memory_space<vmem>>, vector<2x2x128xf32>,
    } else {
    }
    %c0 = arith.constant 0 : index
    %c0_1 = arith.constant 0 : index
    %c0_2 = arith.constant 0 : index
    %c0_3 = arith.constant 0 : index
    %3 = vector.load %arg4[%c0, %c0_1, %c0_2, %c0_3] : memref<1x4x2x128xf32, #tpu.memory_space<vmem>>, vector<1x1x2x128xf32>
    %4 = vector.shape_cast %3 : vector<1x1x2x128xf32> to vector<2x128xf32>
    %c0_4 = arith.constant 0 : index
    %c0_5 = arith.constant 0 : index
    %c0_6 = arith.constant 0 : index
    %c0_7 = arith.constant 0 : index
    %5 = vector.load %arg3[%c0_4, %c0_5, %c0_6, %c0_7] : memref<1x4x2x128xf32, #tpu.memory_space<vmem>>, vector<1x1x2x128xf32>
    %6 = vector.shape_cast %5 : vector<1x1x2x128xf32> to vector<2x128xf32>
    %7 = arith.negf %6 : vector<2x128xf32>
    %8 = math.exp %7 : vector<2x128xf32>
    %cst = arith.constant 1.000000e+00 : f32
    %9 = vector.broadcast %cst : f32 to vector<2x128xf32>
    %10 = arith.addf %9, %8 : vector<2x128xf32>
    %11 = arith.divf %9, %10 : vector<2x128xf32>
    %c0_8 = arith.constant 0 : index
    %12 = memref.load %arg5[%c0_8] : memref<4xf32, #tpu.memory_space<smem>>
    %13 = vector.broadcast %12 : f32 to vector<2x128xf32>
    %14 = math.exp %11 : vector<2x128xf32>
    %c0_9 = arith.constant 0 : index
    %c1 = arith.constant 1 : index
    %c0_10 = arith.constant 0 : index
    %c0_11 = arith.constant 0 : index
    %15 = vector.load %arg4[%c0_9, %c1, %c0_10, %c0_11] : memref<1x4x2x128xf32, #tpu.memory_space<vmem>>, vector<1x1x2x128xf32>
    %16 = vector.shape_cast %15 : vector<1x1x2x128xf32> to vector<2x128xf32>
    %c0_12 = arith.constant 0 : index
    %c1_13 = arith.constant 1 : index
    %c0_14 = arith.constant 0 : index
    %c0_15 = arith.constant 0 : index
    %17 = vector.load %arg3[%c0_12, %c1_13, %c0_14, %c0_15] : memref<1x4x2x128xf32, #tpu.memory_space<vmem>>, vector<1x1x2x128xf32>
    %18 = vector.shape_cast %17 : vector<1x1x2x128xf32> to vector<2x128xf32>
    %19 = arith.negf %18 : vector<2x128xf32>
    %20 = math.exp %19 : vector<2x128xf32>
    %cst_16 = arith.constant 1.000000e+00 : f32
    %21 = vector.broadcast %cst_16 : f32 to vector<2x128xf32>
    %22 = arith.addf %21, %20 : vector<2x128xf32>
    %23 = arith.divf %21, %22 : vector<2x128xf32>
    %24 = arith.cmpf ogt, %16, %4 : vector<2x128xf32>
    %25 = arith.select %24, %16, %4 : vector<2x128xi1>, vector<2x128xf32>
    %26 = arith.select %24, %23, %11 : vector<2x128xi1>, vector<2x128xf32>
    %c1_17 = arith.constant 1 : index
    %27 = memref.load %arg5[%c1_17] : memref<4xf32, #tpu.memory_space<smem>>
    %28 = vector.broadcast %27 : f32 to vector<2x128xf32>
    %29 = arith.select %24, %28, %13 : vector<2x128xi1>, vector<2x128xf32>
    %30 = math.exp %23 : vector<2x128xf32>
    %31 = arith.addf %14, %30 : vector<2x128xf32>
    %c0_18 = arith.constant 0 : index
    %c2 = arith.constant 2 : index
    %c0_19 = arith.constant 0 : index
    %c0_20 = arith.constant 0 : index
    %32 = vector.load %arg4[%c0_18, %c2, %c0_19, %c0_20] : memref<1x4x2x128xf32, #tpu.memory_space<vmem>>, vector<1x1x2x128xf32>
    %33 = vector.shape_cast %32 : vector<1x1x2x128xf32> to vector<2x128xf32>
    %c0_21 = arith.constant 0 : index
    %c2_22 = arith.constant 2 : index
    %c0_23 = arith.constant 0 : index
    %c0_24 = arith.constant 0 : index
    %34 = vector.load %arg3[%c0_21, %c2_22, %c0_23, %c0_24] : memref<1x4x2x128xf32, #tpu.memory_space<vmem>>, vector<1x1x2x128xf32>
    %35 = vector.shape_cast %34 : vector<1x1x2x128xf32> to vector<2x128xf32>
    %36 = arith.negf %35 : vector<2x128xf32>
    %37 = math.exp %36 : vector<2x128xf32>
    %cst_25 = arith.constant 1.000000e+00 : f32
    %38 = vector.broadcast %cst_25 : f32 to vector<2x128xf32>
    %39 = arith.addf %38, %37 : vector<2x128xf32>
    %40 = arith.divf %38, %39 : vector<2x128xf32>
    %41 = arith.cmpf ogt, %33, %25 : vector<2x128xf32>
    %42 = arith.select %41, %33, %25 : vector<2x128xi1>, vector<2x128xf32>
    %43 = arith.select %41, %40, %26 : vector<2x128xi1>, vector<2x128xf32>
    %c2_26 = arith.constant 2 : index
    %44 = memref.load %arg5[%c2_26] : memref<4xf32, #tpu.memory_space<smem>>
    %45 = vector.broadcast %44 : f32 to vector<2x128xf32>
    %46 = arith.select %41, %45, %29 : vector<2x128xi1>, vector<2x128xf32>
    %47 = math.exp %40 : vector<2x128xf32>
    %48 = arith.addf %31, %47 : vector<2x128xf32>
    %c0_27 = arith.constant 0 : index
    %c3 = arith.constant 3 : index
    %c0_28 = arith.constant 0 : index
    %c0_29 = arith.constant 0 : index
    %49 = vector.load %arg4[%c0_27, %c3, %c0_28, %c0_29] : memref<1x4x2x128xf32, #tpu.memory_space<vmem>>, vector<1x1x2x128xf32>
    %50 = vector.shape_cast %49 : vector<1x1x2x128xf32> to vector<2x128xf32>
    %c0_30 = arith.constant 0 : index
    %c3_31 = arith.constant 3 : index
    %c0_32 = arith.constant 0 : index
    %c0_33 = arith.constant 0 : index
    %51 = vector.load %arg3[%c0_30, %c3_31, %c0_32, %c0_33] : memref<1x4x2x128xf32, #tpu.memory_space<vmem>>, vector<1x1x2x128xf32>
    %52 = vector.shape_cast %51 : vector<1x1x2x128xf32> to vector<2x128xf32>
    %53 = arith.negf %52 : vector<2x128xf32>
    %54 = math.exp %53 : vector<2x128xf32>
    %cst_34 = arith.constant 1.000000e+00 : f32
    %55 = vector.broadcast %cst_34 : f32 to vector<2x128xf32>
    %56 = arith.addf %55, %54 : vector<2x128xf32>
    %57 = arith.divf %55, %56 : vector<2x128xf32>
    %58 = arith.cmpf ogt, %50, %42 : vector<2x128xf32>
    %59 = arith.select %58, %57, %43 : vector<2x128xi1>, vector<2x128xf32>
    %c3_35 = arith.constant 3 : index
    %60 = memref.load %arg5[%c3_35] : memref<4xf32, #tpu.memory_space<smem>>
    %61 = vector.broadcast %60 : f32 to vector<2x128xf32>
    %62 = arith.select %58, %61, %46 : vector<2x128xi1>, vector<2x128xf32>
    %63 = math.exp %57 : vector<2x128xf32>
    %64 = arith.addf %48, %63 : vector<2x128xf32>
    %65 = math.log %64 : vector<2x128xf32>
    %66 = arith.subf %65, %59 : vector<2x128xf32>
    %67 = arith.mulf %62, %66 : vector<2x128xf32>
    %c0_36 = arith.constant 0 : index
    %c0_37 = arith.constant 0 : index
    %c0_38 = arith.constant 0 : index
    %68 = vector.load %arg7[%c0_36, %c0_37, %c0_38] : memref<2x2x128xf32, #tpu.memory_space<vmem>>, vector<1x2x128xf32>
    %69 = vector.shape_cast %68 : vector<1x2x128xf32> to vector<2x128xf32>
    %70 = arith.addf %69, %67 : vector<2x128xf32>
    %c0_39 = arith.constant 0 : index
    %c0_40 = arith.constant 0 : index
    %c0_41 = arith.constant 0 : index
    %71 = vector.load %arg7[%c0_39, %c0_40, %c0_41] : memref<2x2x128xf32, #tpu.memory_space<vmem>>, vector<1x2x128xf32>
    %72 = vector.shape_cast %71 : vector<1x2x128xf32> to vector<2x128xf32>
    %73 = vector.shape_cast %70 : vector<2x128xf32> to vector<1x2x128xf32>
    tpu.vector_store %arg7[%c0_39, %c0_40, %c0_41], %73 {strides = array<i32>} : memref<2x2x128xf32, #tpu.memory_space<vmem>>, vector<1x2x128xf32>,
    %c1_42 = arith.constant 1 : index
    %c0_43 = arith.constant 0 : index
    %c0_44 = arith.constant 0 : index
    %74 = vector.load %arg7[%c1_42, %c0_43, %c0_44] : memref<2x2x128xf32, #tpu.memory_space<vmem>>, vector<1x2x128xf32>
    %75 = vector.shape_cast %74 : vector<1x2x128xf32> to vector<2x128xf32>
    %76 = arith.addf %75, %62 : vector<2x128xf32>
    %c1_45 = arith.constant 1 : index
    %c0_46 = arith.constant 0 : index
    %c0_47 = arith.constant 0 : index
    %77 = vector.load %arg7[%c1_45, %c0_46, %c0_47] : memref<2x2x128xf32, #tpu.memory_space<vmem>>, vector<1x2x128xf32>
    %78 = vector.shape_cast %77 : vector<1x2x128xf32> to vector<2x128xf32>
    %79 = vector.shape_cast %76 : vector<2x128xf32> to vector<1x2x128xf32>
    tpu.vector_store %arg7[%c1_45, %c0_46, %c0_47], %79 {strides = array<i32>} : memref<2x2x128xf32, #tpu.memory_space<vmem>>, vector<1x2x128xf32>,
    %c0_i32_48 = arith.constant 0 : i32
    %80 = arith.cmpi eq, %arg2, %c0_i32_48 : i32
    %81 = arith.extui %80 : i1 to i32
    %c0_i32_49 = arith.constant 0 : i32
    %82 = arith.cmpi ne, %81, %c0_i32_49 : i32
    scf.if %82 {
      %c0_50 = arith.constant 0 : index
      %c0_51 = arith.constant 0 : index
      %c0_52 = arith.constant 0 : index
      %83 = vector.load %arg7[%c0_50, %c0_51, %c0_52] : memref<2x2x128xf32, #tpu.memory_space<vmem>>, vector<1x2x128xf32>
      %84 = vector.shape_cast %83 : vector<1x2x128xf32> to vector<2x128xf32>
      %85 = vector.shape_cast %84 : vector<2x128xf32> to vector<1x2x128xf32>
      %cst_53 = arith.constant dense<0.000000e+00> : vector<1xf32>
      %86 = vector.multi_reduction <add>, %85, %cst_53 [1, 2] : vector<1x2x128xf32> to vector<1xf32>
      %87 = vector.shape_cast %86 : vector<1xf32> to vector<1x1x1xf32>
      %88 = vector.extract %87[0, 0, 0] : f32 from vector<1x1x1xf32>
      %c0_54 = arith.constant 0 : index
      %c0_55 = arith.constant 0 : index
      %c0_56 = arith.constant 0 : index
      %89 = memref.load %arg6[%c0_54, %c0_55, %c0_56] : memref<1x1x2xf32, #tpu.memory_space<smem>>
      memref.store %88, %arg6[%c0_54, %c0_55, %c0_56] : memref<1x1x2xf32, #tpu.memory_space<smem>>
      %c1_57 = arith.constant 1 : index
      %c0_58 = arith.constant 0 : index
      %c0_59 = arith.constant 0 : index
      %90 = vector.load %arg7[%c1_57, %c0_58, %c0_59] : memref<2x2x128xf32, #tpu.memory_space<vmem>>, vector<1x2x128xf32>
      %91 = vector.shape_cast %90 : vector<1x2x128xf32> to vector<2x128xf32>
      %92 = vector.shape_cast %91 : vector<2x128xf32> to vector<1x2x128xf32>
      %cst_60 = arith.constant dense<0.000000e+00> : vector<1xf32>
      %93 = vector.multi_reduction <add>, %92, %cst_60 [1, 2] : vector<1x2x128xf32> to vector<1xf32>
      %94 = vector.shape_cast %93 : vector<1xf32> to vector<1x1x1xf32>
      %95 = vector.extract %94[0, 0, 0] : f32 from vector<1x1x1xf32>
      %c0_61 = arith.constant 0 : index
      %c0_62 = arith.constant 0 : index
      %c1_63 = arith.constant 1 : index
      %96 = memref.load %arg6[%c0_61, %c0_62, %c1_63] : memref<1x1x2xf32, #tpu.memory_space<smem>>
      memref.store %95, %arg6[%c0_61, %c0_62, %c1_63] : memref<1x1x2xf32, #tpu.memory_space<smem>>
    } else {
    }
    return
  }
  func.func @transform_0(%arg0: i32, %arg1: i32, %arg2: i32) -> (i32, i32, i32, i32) {
    %c1_i32 = arith.constant 1 : i32
    %0 = arith.muli %arg1, %c1_i32 : i32
    %1 = arith.addi %0, %arg2 : i32
    %c0_i32 = arith.constant 0 : i32
    %c0_i32_0 = arith.constant 0 : i32
    %c0_i32_1 = arith.constant 0 : i32
    return %arg0, %c0_i32, %1, %c0_i32_0 : i32, i32, i32, i32
  }
  func.func @transform_1(%arg0: i32, %arg1: i32, %arg2: i32) -> (i32, i32, i32, i32) {
    %c1_i32 = arith.constant 1 : i32
    %0 = arith.muli %arg1, %c1_i32 : i32
    %1 = arith.addi %0, %arg2 : i32
    %c0_i32 = arith.constant 0 : i32
    %c0_i32_0 = arith.constant 0 : i32
    %c0_i32_1 = arith.constant 0 : i32
    return %arg0, %c0_i32, %1, %c0_i32_0 : i32, i32, i32, i32
  }
  func.func @transform_2(%arg0: i32, %arg1: i32, %arg2: i32) -> i32 {
    %c0_i32 = arith.constant 0 : i32
    %c0_i32_0 = arith.constant 0 : i32
    return %c0_i32 : i32
  }
  func.func @transform_3(%arg0: i32, %arg1: i32, %arg2: i32) -> (i32, i32, i32) {
    %c0_i32 = arith.constant 0 : i32
    %c0_i32_0 = arith.constant 0 : i32
    return %arg0, %arg1, %c0_i32 : i32, i32, i32
  }
}

</mosaic_0001>

<bundles_post_ra>
// kernel: tpu_custom_call.1
= control target key start
LH: loop header
LB: loop body
LE: loop exit
PB: predicated region body
PF: predicated region fallthrough
CT: control target
= control target key end

     0   :  { %s1126_s0 = inlined_call_operand.hbm [shape: f32[2,4,2,128], index: 0, kind: input, shape index: {}]   ;;  %s1127_s1 = inlined_call_operand.hbm [shape: f32[2,4,2,128], index: 1, kind: input, shape index: {}]   ;;  %s1128_s2 = inlined_call_operand.vmem [shape: f32[4], index: 2, kind: input, shape index: {}]   ;;  %s1129_s3 = inlined_call_operand.hbm [shape: f32[2,1,2], index: 3, kind: output, shape index: {}]  }
   0x1   :  { %1136 = sst [smem:[#allocation15_spill]] %s1126_s0 }
   0x2   :  { %1137 = sst [smem:[#allocation16_spill]] %s1128_s2 }
   0x3   :  { %8 = vsyncpa [#allocation4], 0 }
   0x4   :  { %10 = vsyncpa [#allocation4 + $0x1], 0 }
   0x5   :  { %11 = vsyncpa [#allocation8], 0 }
   0x6   :  { %13 = vsyncpa [#allocation8 + $0x1], 0 }
   0x7   :  { %14 = vsyncpa [#allocation6], 0 }
   0x8   :  { %15 = vsyncpa [#allocation5], 0 }
   0x9   :  { %17 = vsyncpa [#allocation5 + $0x1], 0  ;;  %s850_s12 = smov 0   ;;  %s852_s13 = smov 0  }
   0xa   :  { %s854_s14 = smov 0   ;;  %s856_s15 = smov 0  }
   0xb   :  { %s858_s16 = smov 0   ;;  %s860_s17 = smov 0  }
   0xc LB: > { %s530_s18 = sadd.s32 4294967295, %s822_s17   ;;  %s531_s19 = sadd.s32 4294967294, %s822_s17   ;;  %s822_s17 = sphi %s860_s17, %s23_s17   ;;  %s818_s16 = sphi %s858_s16, %s1157_s16   ;;  %s814_s15 = sphi %s856_s15, %s1156_s15   ;;  %s810_s14 = sphi %s854_s14, %s1155_s14   ;;  %s806_s13 = sphi %s852_s13, %s1154_s13   ;;  %s802_s12 = sphi %s850_s12, %s1153_s12  }
   0xd   : > { %s53_s20 = sadd.s32 1, %s810_s14  ;;  %p60_p0 = scmp.ne.s32.totalorder %s810_s14, %s806_s13 }
   0xe   : > { %p61_p1 = scmp.eq.s32.totalorder %s822_s17, 0  ;;  %p66_p2 = scmp.ne.s32.totalorder %s806_s13, %s802_s12 }
   0xf   : > { %p888_p3 = scmp.eq.s32.totalorder %s530_s18, 0  ;;  %p143_p4 = scmp.eq.s32.totalorder %s530_s18, 1 }
  0x10   : > { %p62_p5 = por %p61_p1, %p60_p0  ;;  %p149_p6 = scmp.eq.s32.totalorder %s531_s19, 1 }
  0x11   : > { %s1138_s21 = scalar_select %p888_p3, 1, 0 }
  0x12   : > { %p894_p7 = por %p888_p3, %p66_p2  ;;  %p898_p8 = por %p143_p4, %p60_p0 }
  0x13   : > { %p902_p9 = por %p149_p6, %p66_p2  ;;  %p532_p10 = scmp.ge.s32.totalorder %s822_s17, 1 }
  0x14   : > { %s1139_s22 = scalar_select %p894_p7, 1, 0 }
  0x15   : > { %s1140_s23 = scalar_select %p898_p8, 1, 0 }
  0x16   : > { %s1141_s24 = scalar_select %p902_p9, 1, 0 }
  0x17   : > { %p156_p11 = scmp.lt.s32.totalorder %s822_s17, 3  ;;  %s1142_s2 = sld [smem:[#allocation16_spill]] }
  0x18   : > { %p1130_p13 = scmp.lt.s32.totalorder %s822_s17, 2  ;;  %s42_s4 = sadd.s32 1, %s818_s16 }
  0x19   : > { %p911_p12 = pnand %p532_p10, %p156_p11  ;;  %p931_p4 = scmp.ge.s32.totalorder %s42_s4, 2 }
  0x1a   : > { %p920_p1 = pnand %p1130_p13, %p62_p5  ;;  %s936_s6 = sand.u32 1, %s810_s14  }
  0x1b   : > { %p579_p0 = pneg %p911_p12 }
  0x1d   : > { %s169_s27 = sshll.u32 %s1142_s2, 4  ;;  %p926_p2 = pnand %p579_p0, %p888_p3  ;;  %s170_s27 = int_to_ptr.vmem [resolvable:$true] %s169_s27 }
  0x1e   : > { %s671_s7 = scalar_lea.vmem %s170_s27, 16  ;;  %p679_p13 = scmp.lt.s32.totalorder %s170_s27, %s170_s27 }
  0x1f   : > { %p672_p6 = scmp.ne.s32.totalorder %s170_s27, %s671_s7  ;;  %p673_p5 = pneg %p926_p2 }
  0x20   : > { %p680_p9 = scmp.lt.s32.totalorder %s671_s7, %s671_s7 }
  0x21   : > { %p674_p10 = pnand %p673_p5, %p672_p6 }
  0x22   : > { %p681_p0 = por %p680_p9, %p679_p13 }
  0x23   : > { %p675_p11 = pneg %p674_p10 }
  0x25   : > { %p682_p8 = pnand %p681_p0, %p675_p11 }
  0x27   : > { %685 = shalt.err (!%p682_p8)
}
  0x28   : > { %s824_s8 = smov [#allocation9]   ;;  %s1159_s4 = smov (%p931_p4, %s42_s4), 0 }
  0x29   : > { %582 = dma.vmem_to_smem (!%p926_p2), %s170_s27, 16, %s824_s8, [#allocation6]  }
  0x2a   : > { %s535_s9 = sshll.u32 %s936_s6, 3  ;;  %s48_s10 = ssub.s32 %s818_s16, %s1159_s4 }
  0x2b   : > { %p51_p8 = scmp.eq.s32.totalorder %s48_s10, 0  ;;  %s563_s11 = sshll.u32 %s818_s16, 7 }
  0x2c   : > { %s1147_s0 = sld [smem:[#allocation15_spill]]  ;;  %s184_s26 = scalar_lea.vmem [#allocation3], %s535_s9 }
  0x2d   : > { %s193_s27 = sshll.u32 %s184_s26, 4  ;;  %s181_s5 = scalar_lea.sflag [#allocation4], %s936_s6  ;;  %s964_s27 = int_to_ptr.vmem [resolvable:$true] %s193_s27 }
  0x2e   : > { %s962_s30 = scalar_select %p51_p8, %s810_s14, %s53_s20  }
  0x2f   : > { %p688_p13 = pneg %p920_p1 }
  0x32   : > { %s955_s25 = scalar_lea.hbm %s1147_s0, %s563_s11  ;;  %s691_s18 = scalar_lea.hbm %s1147_s0, 256 }
  0x33   : > { %s686_s7 = scalar_lea.hbm %s955_s25, 128  ;;  %p692_p6 = scmp.lt.u32.totalorder %s955_s25, %s1147_s0 }
  0x34   : > { %p687_p9 = scmp.ne.s32.totalorder %s955_s25, %s686_s7  ;;  %p693_p5 = scmp.lt.u32.totalorder %s691_s18, %s686_s7 }
  0x35   : > { %p695_p11 = scmp.lt.u32.totalorder %s686_s7, %s955_s25 }
  0x36   : > { %p689_p2 = pnand %p688_p13, %p687_p9  ;;  %p694_p10 = por %p693_p5, %p692_p6 }
  0x38   : > { %p690_p4 = pneg %p689_p2  ;;  %p696_p0 = por %p695_p11, %p694_p10 }
  0x3a   : > { %p697_p8 = pnand %p696_p0, %p690_p4 }
  0x3c   : > { %700 = shalt.err (!%p697_p8)
}
  0x3d   : > { %s701_s20 = scalar_lea.vmem %s964_s27, 128  ;;  %s825_s8 = smov [#allocation3]  }
  0x3e   : > { %p702_p9 = scmp.ne.s32.totalorder %s964_s27, %s701_s20  ;;  %s706_s10 = sshll.u32 %s825_s8, 4  ;;  %s707_s10 = int_to_ptr.vmem [resolvable:$false] %s706_s10 }
  0x3f   : > { %s708_s19 = scalar_lea.vmem %s707_s10, 256  ;;  %p709_p7 = scmp.lt.s32.totalorder %s964_s27, %s707_s10 }
  0x40   : > { %p704_p2 = pnand %p702_p9, %p688_p13  ;;  %p710_p6 = scmp.lt.s32.totalorder %s708_s19, %s701_s20 }
  0x42   : > { %p705_p3 = pneg %p704_p2  ;;  %p711_p5 = por %p710_p6, %p709_p7 }
  0x44   : > { %p712_p10 = pnand %p711_p5, %p705_p3 }
  0x46   : > { %715 = shalt.err (!%p712_p10)
}
  0x47   : > { %s826_s7 = smov 32   ;;  %s827_s18 = smov 2  }
  0x48   : > { %586 = dma.hbm_to_vmem [thread:$0]  (!%p920_p1), %s955_s25, 128, %s964_s27, %s181_s5, %s826_s7, %s826_s7, %s827_s18  }
  0x49   : > { %s1002_s8 = scalar_lea.hbm %s1127_s1, %s563_s11  ;;  %s207_s10 = scalar_lea.vmem [#allocation7], %s535_s9 }
  0x4a   : > { %s216_s19 = sshll.u32 %s207_s10, 4  ;;  %s204_s0 = scalar_lea.sflag [#allocation8], %s936_s6  ;;  %s1006_s19 = int_to_ptr.vmem [resolvable:$true] %s216_s19 }
  0x4b   : > { %s716_s2 = scalar_lea.hbm %s1002_s8, 128  ;;  %s721_s11 = scalar_lea.hbm %s1127_s1, 256 }
  0x4c   : > { %p717_p3 = scmp.ne.s32.totalorder %s1002_s8, %s716_s2  ;;  %p722_p11 = scmp.lt.u32.totalorder %s1002_s8, %s1127_s1 }
  0x4d   : > { %p723_p0 = scmp.lt.u32.totalorder %s721_s11, %s716_s2  ;;  %p725_p9 = scmp.lt.u32.totalorder %s716_s2, %s1002_s8 }
  0x4e   : > { %p719_p7 = pnand %p717_p3, %p688_p13 }
  0x4f   : > { %p724_p8 = por %p723_p0, %p722_p11 }
  0x50   : > { %p720_p4 = pneg %p719_p7 }
  0x51   : > { %p726_p2 = por %p725_p9, %p724_p8 }
  0x53   : > { %p727_p6 = pnand %p726_p2, %p720_p4 }
  0x55   : > { %730 = shalt.err (!%p727_p6)
}
  0x56   : > { %s731_s9 = scalar_lea.vmem %s1006_s19, 128  ;;  %s828_s20 = smov [#allocation7]  }
  0x57   : > { %p732_p5 = scmp.ne.s32.totalorder %s1006_s19, %s731_s9  ;;  %s736_s10 = sshll.u32 %s828_s20, 4  ;;  %s737_s10 = int_to_ptr.vmem [resolvable:$false] %s736_s10 }
  0x58   : > { %s738_s25 = scalar_lea.vmem %s737_s10, 256  ;;  %p739_p7 = scmp.lt.s32.totalorder %s1006_s19, %s737_s10 }
  0x59   : > { %p734_p10 = pnand %p732_p5, %p688_p13  ;;  %p740_p11 = scmp.lt.s32.totalorder %s738_s25, %s731_s9 }
  0x5b   : > { %p735_p3 = pneg %p734_p10  ;;  %p741_p0 = por %p740_p11, %p739_p7 }
  0x5d   : > { %p742_p8 = pnand %p741_p0, %p735_p3 }
  0x5f   : > { %745 = shalt.err (!%p742_p8)
}
  0x60   : > { %589 = dma.hbm_to_vmem [thread:$0]  (!%p920_p1), %s1002_s8, 128, %s1006_s19, %s204_s0, %s826_s7, %s826_s7, %s827_s18  }
  0x61   : > { %228 = sbr.rel (%p911_p12) target bundleno = 399 (0x18f), region = 32  ;;  %s1040_s2 = sand.u32 (!%p911_p12), 1, %s806_s13  }
  0x62   : > { %s542_s27 = sshll.u32 (!%p911_p12), %s1040_s2, 3  ;;  %s231_s11 = scalar_lea.sflag (!%p911_p12), [#allocation4], %s1040_s2 }
  0x63   : > { %s234_s29 = scalar_lea.vmem (!%p911_p12), [#allocation3], %s542_s27  ;;  %p1148_p13 = scmp.ne.s32.totalorder (!%p911_p12), %s1139_s22, 0 }
  0x68   : > { %785 = dma.done.wait (%p1148_p13), %s231_s11, 128  }
  0x69   : > { %787 = vsyncadd (%p1148_p13), %s231_s11, 4294967168  ;;  %s240_s0 = scalar_lea.sflag [#allocation8], %s1040_s2  ;;  %s1049_s6 = scalar_lea.vmem [#allocation7], %s542_s27 }
  0x6a   : > { %789 = dma.done.wait (%p1148_p13), %s240_s0, 128  }
  0x6b   : > { %791 = vsyncadd (%p1148_p13), %s240_s0, 4294967168  ;;  %p1149_p12 = scmp.ne.s32.totalorder %s1138_s21, 0 }
  0x6d   : > { %793 = dma.done.wait (%p1149_p12), [#allocation6], 16  }
  0x6e   : > { %795 = vsyncadd (%p1149_p12), [#allocation6], 4294967280 }
  0x6f   : > { %252 = sfence }
  0x70   : > { %v1060_v0 = vld [vmem:[%s1049_s6] sm:$0x3]  ;;  %v285_v1 = vld [vmem:[%s234_s29] sm:$0x3]  ;;  %v829_v2 = vmov 0.0   ;;  %s292_s28 = sld [smem:[#allocation9]] }
  0x71   : > { %282 = vst [vmem:[#allocation2] sm:$0x3] %v829_v2  ;;  %v546_v3 = vmul.f32 -1.442695, %v285_v1  ;;  %v1063_v4 = vld [vmem:[%s1049_s6 + $0x2] sm:$0x3] }
  0x72   : > { %283 = vst [vmem:[#allocation2 + $0x2] sm:$0x3] %v829_v2  ;;  %v548_v5 = vld [vmem:[%s234_s29 + $0x2] sm:$0x3]  ;;  %vm306_vm0 = vcmp.gt.f32.partialorder %v1063_v4, %v1060_v0  ;;  %s550_s21 = sld [smem:[#allocation9 + $0x1]]  ;;  %s554_s22 = sld [smem:[#allocation9 + $0x2]] }
  0x73   : > { %v551_v6 = vld [vmem:[%s1049_s6 + $0x4] sm:$0x3]  ;;  %645 = vpow2.f32 %v546_v3  ;;  %v549_v7 = vmul.f32 -1.442695, %v548_v5  ;;  %v307_v8 = vsel %vm306_vm0, %v1063_v4, %v1060_v0  ;;  %v552_v9 = vld [vmem:[%s234_s29 + $0x4] sm:$0x3] }
  0x74   : > { %v553_v10 = vmul.f32 -1.442695, %v552_v9  ;;  %v556_v11 = vld [vmem:[%s234_s29 + $0x6] sm:$0x3]  ;;  %vm325_vm1 = vcmp.gt.f32.partialorder %v551_v6, %v307_v8  ;;  %s558_s7 = sld [smem:[#allocation9 + $0x3]]  ;;  %vm367_vm3 = vcmask 1041408  }
  0x75   : > { %647 = vpow2.f32 %v549_v7  ;;  %v557_v12 = vmul.f32 -1.442695, %v556_v11  ;;  %v326_v15 = vsel %vm325_vm1, %v551_v6, %v307_v8  ;;  %v555_v16 = vld [vmem:[%s1049_s6 + $0x6] sm:$0x3]  ;;  %s545_s18 = sshll.u32 %s1040_s2, 7  ;;  %s560_s19 = sshll.u32 %s814_s15, 4 }
  0x76   : > { %649 = vpow2.f32 %v553_v10  ;;  %v293_v13 = vstv %s292_s28  ;;  %vm344_vm2 = vcmp.gt.f32.partialorder %v555_v16, %v326_v15  ;;  %s275_s5 = scalar_lea.smem [#allocation10], %s545_s18  ;;  %s406_s10 = scalar_lea.hbm %s1129_s3, %s560_s19 }
  0x77   : > { %651 = vpow2.f32 %v557_v12  ;;  %s391_s26 = scalar_lea.smem %s275_s5, 1 [#allocation10]  ;;  %s394_s27 = scalar_lea.sflag [#allocation5], %s1040_s2 }
  0x78   : > { %v310_v14 = vstv %s550_s21  ;;  %v329_v18 = vstv %s554_s22  ;;  %v356_v53 = vld [vmem:[#allocation2] sm:$0x3]  ;;  %s746_s11 = scalar_lea.hbm %s406_s10, 16  ;;  %p1150_p4 = scmp.ne.s32.totalorder %s1140_s23, 0 }
  0x79   : > { %v311_v17 = vsel %vm306_vm0, %v310_v14, %v293_v13  ;;  %v360_v20 = vld [vmem:[#allocation2 + $0x2] sm:$0x3]  ;;  %p747_p1 = scmp.ne.s32.totalorder %s406_s10, %s746_s11  ;;  %s750_s6 = scalar_lea.hbm %s1129_s3, 32 }
  0x7a   : > { %v330_v19 = vsel %vm325_vm1, %v329_v18, %v311_v17  ;;  %v347_v21 = vstv %s558_s7  ;;  %p751_p6 = scmp.lt.u32.totalorder %s406_s10, %s1129_s3  ;;  %p752_p5 = scmp.lt.u32.totalorder %s750_s6, %s746_s11 }
  0x7b   : > { %v348_v22 = vsel %vm344_vm2, %v347_v21, %v330_v19  ;;  %p748_p9 = pnand %p747_p1, %p1150_p4  ;;  %p754_p3 = scmp.lt.u32.totalorder %s746_s11, %s406_s10 }
  0x7c   : > { %v361_v24 = vadd.f32 %v360_v20, %v348_v22  ;;  %p753_p10 = por %p752_p5, %p751_p6 }
  0x7d   : > { %v646_v23 = vpop.eup %645  ;;  %p749_p2 = pneg %p748_p9 }
  0x7e   : > { %v289_v25 = vadd.f32 1.0, %v646_v23  ;;  %362 = vst [vmem:[#allocation2 + $0x2] sm:$0x3] %v361_v24  ;;  %p755_p7 = por %p754_p3, %p753_p10 }
  0x7f   : > { %v648_v26 = vpop.eup %647 }
  0x80   : > { %v650_v27 = vpop.eup %649  ;;  %653 = vrcp.f32 %v289_v25  ;;  %v303_v28 = vadd.f32 1.0, %v648_v26  ;;  %p756_p11 = pnand %p755_p7, %p749_p2 }
  0x81   : > { %v652_v29 = vpop.eup %651  ;;  %v322_v30 = vadd.f32 1.0, %v650_v27 }
  0x82   : > { %655 = vrcp.f32 %v303_v28  ;;  %v341_v31 = vadd.f32 1.0, %v652_v29 }
  0x83   : > { %657 = vrcp.f32 %v322_v30 }
  0x84   : > { %659 = vrcp.f32 %v341_v31 }
  0x85   : > { %v380_v57 = vld [vmem:[#allocation2 + $0x2] sm:$0x3] }
  0x86   : > { %v381_v59 = vsel %vm367_vm3, %v380_v57, 0.0 }
  0x8a   : > { %v654_v32 = vpop.eup %653 }
  0x8b   : > { %v294_v33 = vmul.f32 1.442695, %v654_v32 }
  0x8c   : > { %v656_v34 = vpop.eup %655 }
  0x8d   : > { %v658_v35 = vpop.eup %657  ;;  %661 = vpow2.f32 %v294_v33  ;;  %v312_v36 = vmul.f32 1.442695, %v656_v34  ;;  %v308_v47 = vsel %vm306_vm0, %v656_v34, %v654_v32 }
  0x8e   : > { %v660_v37 = vpop.eup %659  ;;  %v331_v38 = vmul.f32 1.442695, %v658_v35  ;;  %v327_v48 = vsel %vm325_vm1, %v658_v35, %v308_v47 }
  0x8f   : > { %663 = vpow2.f32 %v312_v36  ;;  %v349_v39 = vmul.f32 1.442695, %v660_v37  ;;  %v345_v50 = vsel %vm344_vm2, %v660_v37, %v327_v48 }
  0x90   : > { %665 = vpow2.f32 %v331_v38 }
  0x91   : > { %667 = vpow2.f32 %v349_v39 }
  0x97   : > { %v662_v40 = vpop.eup %661 }
  0x99   : > { %v664_v41 = vpop.eup %663 }
  0x9a   : > { %v666_v42 = vpop.eup %665  ;;  %v314_v43 = vadd.f32 %v664_v41, %v662_v40 }
  0x9b   : > { %v668_v44 = vpop.eup %667 }
  0x9c   : > { %v333_v45 = vadd.f32 %v666_v42, %v314_v43 }
  0x9e   : > { %v351_v46 = vadd.f32 %v668_v44, %v333_v45 }
  0xa0   : > { %669 = vlog2.f32 %v351_v46 }
  0xaa   : > { %v670_v49 = vpop.eup %669 }
  0xab   : > { %v353_v51 = vmul.f32 0.6931472, %v670_v49 }
  0xad   : > { %v354_v52 = vsub.f32 %v353_v51, %v345_v50 }
  0xaf   : > { %v355_v54 = vmul.f32 %v354_v52, %v348_v22 }
  0xb1   : > { %v357_v55 = vadd.f32 %v356_v53, %v355_v54 }
  0xb3   : > { %358 = vst [vmem:[#allocation2] sm:$0x3] %v357_v55 }
  0xba   : > { %v366_v56 = vld [vmem:[#allocation2] sm:$0x3] }
  0xbb   : > { %v368_v58 = vsel %vm367_vm3, %v366_v56, 0.0 }
  0xbc   : > { %369 = vadd.xlane.f32.xlu0 %v368_v58 }
  0xc0   : > { %382 = vadd.xlane.f32.xlu0 %v381_v59 }
 0x149   : > { %v370_v60 = vpop.xlane.xlu0 %369 }
 0x14a   : > { %v371_v61 = vrot.slane %v370_v60, 4 }
 0x14c   : > { %v372_v62 = vadd.f32 %v371_v61, %v370_v60 }
 0x14d   : > { %v383_v63 = vpop.xlane.xlu0 %382 }
 0x14e   : > { %v373_v0 = vrot.slane %v372_v62, 2  ;;  %v384_v1 = vrot.slane %v383_v63, 4 }
 0x150   : > { %v385_v2 = vadd.f32 %v384_v1, %v383_v63  ;;  %v374_v3 = vadd.f32 %v373_v0, %v372_v62 }
 0x152   : > { %v386_v4 = vrot.slane %v385_v2, 2  ;;  %v375_v5 = vrot.slane %v374_v3, 1 }
 0x154   : > { %v387_v6 = vadd.f32 %v386_v4, %v385_v2  ;;  %v376_v7 = vadd.f32 %v375_v5, %v374_v3 }
 0x156   : > { %565 = vpush %v376_v7  ;;  %v388_v8 = vrot.slane %v387_v6, 1 }
 0x158   : > { %v389_v9 = vadd.f32 %v388_v8, %v387_v6 }
 0x15a   : > { %567 = vpush %v389_v9 }
 0x187   : > { %s566_s8 = spop %565 }
 0x188   : > { %379 = sst [smem:[%s275_s5]] %s566_s8 }
 0x18b   : > { %s568_s25 = spop %567 }
 0x18c   : > { %392 = sst [smem:[%s391_s26]] %s568_s25 }
 0x18d   : > { %759 = shalt.err (!%p756_p11)
}
 0x18e   : > { %577 = dma.smem_to_hbm (%p1150_p4), %s275_s5, 16, %s406_s10, %s394_s27  }
 0x18f PF: > { %p1151_p0 = scmp.lt.s32.totalorder %s822_s17, 2 }
 0x190   : > { %s418_s2 = sand.u32 (!%p1151_p0), 1, %s802_s12   ;;  %p1152_p8 = scmp.ne.s32.totalorder (!%p1151_p0), %s1141_s24, 0 }
 0x191   : > { %413 = sbr.rel (%p1151_p0) target bundleno = 411 (0x19b), region = 60  ;;  %s419_s21 = scalar_lea.sflag (!%p1151_p0), [#allocation5], %s418_s2 }
 0x198   : > { %797 = dma.done.wait (%p1152_p8), %s419_s21, 16  }
 0x199   : > { %799 = vsyncadd (%p1152_p8), %s419_s21, 4294967280 }
 0x19a   : > { %424 = sfence }
 0x19b PF: > { %s23_s17 = sadd.s32 1, %s822_s17   ;;  %s1153_s12 = smov %s806_s13 }
 0x19c   : > { %p20_p13 = scmp.ge.s32.totalorder %s23_s17, 4   ;;  %s1154_s13 = smov %s810_s14 }
 0x19d   : > { %s1155_s14 = smov %s962_s30  ;;  %s1156_s15 = smov %s818_s16 }
 0x19e   : > { %s1157_s16 = smov %s1159_s4  ;;  %22 = sbr.rel (!%p20_p13) target bundleno = 12 (0xc), region = 112 }
 0x1a5   :  { %425 = vsyncpa [#allocation4], 1 }
 0x1a6   :  { %427 = vsyncpa [#allocation4 + $0x1], 1 }
 0x1a7   :  { %428 = vsyncpa [#allocation8], 1 }
 0x1a8   :  { %430 = vsyncpa [#allocation8 + $0x1], 1 }
 0x1a9   :  { %431 = vsyncpa [#allocation5], 1 }
 0x1aa   :  { %433 = vsyncpa [#allocation5 + $0x1], 1 }
 0x1ab   :  { %434 = vsyncpa [#allocation6], 1 }
 0x1ac   :  { %436 = vsyncpa [#allocation6 + $0x1], 1 }

</bundles_post_ra>
